<compile_context>
chip_gen: v7x
topology: tpu7x:2x2x1
jax: 0.10.0
libtpu: 0.0.40
codegen_flags: <defaults>
</compile_context>

<pallas_src>
import numpy as np
import jax
import jax.numpy as jnp
from jax.experimental import pallas as pl
from jax.experimental.pallas import tpu as pltpu


# ----------------------------- Pallas kernel ------------------------------ #

def _vmf_kernel(logc_ref, x_ref, mu_ref, o_ref):
    # logc_ref: (1, 1) f32 scalar in SMEM.
    # x_ref:    (tb, d) tile of x in its native dtype (contiguous HBM rows).
    # mu_ref:   (d, 1)  kappa-scaled mu column in x's dtype, resident.
    # o_ref:    (tb, 1) f32 output block.
    logc = logc_ref[0, 0]
    # MXU matvec with f32 accumulation; reduction happens inside the systolic
    # array, so no (tb, d) f32 intermediate and no per-tile VPU upcast.
    dotp = jnp.dot(x_ref[...], mu_ref[...], preferred_element_type=jnp.float32)
    o_ref[...] = dotp + logc


# ------------------------------ tiling choice ------------------------------ #

def _round_up(x, m):
    return (x + m - 1) // m * m


def _choose_batch_tile(batch, d, itemsize, target_bytes=8 * 1024 * 1024):
    """Per-buffer x tile sized ~target_bytes (Pallas double-buffers it), batch
    tile a multiple of 128.  Small batches get one full-extent block; large
    batches aim for >= 4 grid steps so the 'parallel' axis can split across
    v7x's two TensorCores."""
    if batch <= 1024:
        return int(batch)                      # single block, full extent
    tb = (target_bytes // max(1, d * itemsize)) // 128 * 128
    tb = max(128, min(int(tb), _round_up(batch, 128)))
    # Best effort: at least ~4 grid steps for megacore load balance.
    if (batch + tb - 1) // tb < 4:
        tb = max(128, min(tb, _round_up((batch + 3) // 4, 128)))
    return int(tb)


# ------------------------------ pallas wrapper ----------------------------- #

def vmf_log_likelihood_pallas(x, mu_scaled, logC, *, tb=None):
    """x: (B, d) features in native layout/dtype (f32 or bf16).
    mu_scaled: (d,) kappa * mu in x's dtype. logC: scalar. Returns (B,) f32."""
    B, d = x.shape
    itemsize = jnp.dtype(x.dtype).itemsize
    if tb is None:
        tb = _choose_batch_tile(B, d, itemsize)
    n_blocks = pl.cdiv(B, tb)

    logc_arr = jnp.asarray(logC, jnp.float32).reshape(1, 1)
    mu_col = jnp.asarray(mu_scaled, x.dtype).reshape(d, 1)

    out = pl.pallas_call(
        _vmf_kernel,
        out_shape=jax.ShapeDtypeStruct((B, 1), jnp.float32),
        grid=(n_blocks,),
        in_specs=[
            pl.BlockSpec(memory_space=pltpu.SMEM),     # logC (1, 1) scalar
            pl.BlockSpec((tb, d), lambda i: (i, 0)),   # x tile, native (B, d)
            pl.BlockSpec((d, 1), lambda i: (0, 0)),    # kappa*mu, resident
        ],
        out_specs=pl.BlockSpec((tb, 1), lambda i: (i, 0)),
        compiler_params=pltpu.CompilerParams(
            dimension_semantics=("parallel",),
            vmem_limit_bytes=48 * 1024 * 1024),
    )(logc_arr, x, mu_col)
    return out[:, 0]


# --------------------------- glue (plain JAX) ------------------------------ #

def _log_bessel_iv(s, kappa, num_terms=128):
    """log I_s(kappa): ascending power series for moderate kappa, large-argument
    asymptotic expansion for large kappa (series peak ~ kappa/2 must stay well
    inside num_terms)."""
    m = jnp.arange(num_terms, dtype=jnp.float32)
    log_half_k = jnp.log(kappa * 0.5)
    series = jax.scipy.special.logsumexp(
        (2.0 * m + s) * log_half_k
        - jax.scipy.special.gammaln(m + 1.0)
        - jax.scipy.special.gammaln(m + s + 1.0))
    # Large-argument expansion: I_s(k) ~ e^k / sqrt(2*pi*k) * (1 - (4s^2-1)/(8k) + ...)
    mu4 = 4.0 * s * s
    t1 = (mu4 - 1.0) / (8.0 * kappa)
    t2 = (mu4 - 1.0) * (mu4 - 9.0) / (2.0 * (8.0 * kappa) ** 2)
    t3 = (mu4 - 1.0) * (mu4 - 9.0) * (mu4 - 25.0) / (6.0 * (8.0 * kappa) ** 3)
    corr = jnp.maximum(-t1 + t2 - t3, -0.999)  # guard unselected branch
    asym = kappa - 0.5 * jnp.log(2.0 * jnp.pi * kappa) + jnp.log1p(corr)
    # TODO(synk): for simultaneously large d (order s) and kappa, switch to the
    # uniform asymptotic expansion in the order (or float64) for full accuracy.
    return jnp.where(kappa < 0.5 * num_terms, series, asym)


def vmf_forward(x, mu_unnorm, log_kappa, reg=1e-6, utc=False):
    """Mirrors vMF.forward. x: (B, d) batch of (L2-normalized) features."""
    d = x.shape[1]
    # get_params()
    mu_norm = jnp.maximum(jnp.linalg.norm(mu_unnorm, ord=2), 1e-12)
    mu = mu_unnorm / mu_norm
    kappa = jnp.exp(log_kappa) + reg
    if utc:
        logC = jnp.float32(0.0)
    else:
        s = 0.5 * d - 1.0
        nhlog2pi = -0.5 * np.log(2.0 * np.pi)
        logI = _log_bessel_iv(s, kappa)
        logC = d * nhlog2pi + s * jnp.log(kappa) - logI
    # Fold kappa into mu (d-element vector, free) so the kernel is matvec + add.
    mu_scaled = (kappa * mu).astype(x.dtype)
    return vmf_log_likelihood_pallas(x, mu_scaled, logC)


# --------------------------------- main ------------------------------------ #

if __name__ == "__main__":
    key = jax.random.PRNGKey(0)
    k_x, k_mu, k_kappa, k_x2 = jax.random.split(key, 4)

    B, d = 16, 32  # x_dim = 32

    # Deterministic "parameters" (equivalent of nn.Parameter init).
    mu_unnorm = jax.random.normal(k_mu, (d,), dtype=jnp.float32)
    log_kappa = 0.01 * jax.random.normal(k_kappa, (), dtype=jnp.float32)

    # Input: batch of L2-normalized features, shape (B, d).
    x = jax.random.normal(k_x, (B, d), dtype=jnp.float32)
    x = x / jnp.linalg.norm(x, axis=1, keepdims=True)

    out = jax.block_until_ready(vmf_forward(x, mu_unnorm, log_kappa))

    # Pure-JAX reference for the same computation (sanity check of the kernel).
    mu_ref = mu_unnorm / jnp.maximum(jnp.linalg.norm(mu_unnorm), 1e-12)
    kappa_ref = jnp.exp(log_kappa) + 1e-6
    s_ref = 0.5 * d - 1.0
    logC_ref = (d * (-0.5 * np.log(2.0 * np.pi))
                + s_ref * jnp.log(kappa_ref)
                - _log_bessel_iv(s_ref, kappa_ref))
    ref = kappa_ref * jnp.sum(mu_ref[None, :] * x, axis=1) + logC_ref

    assert out.shape == (B,)
    np.testing.assert_allclose(np.asarray(out), np.asarray(ref),
                               rtol=1e-5, atol=1e-5)

    # Ragged-batch path: last block handled by Pallas masking (no wrapper pad).
    B2 = 200
    x2 = jax.random.normal(k_x2, (B2, d), dtype=jnp.float32)
    x2 = x2 / jnp.linalg.norm(x2, axis=1, keepdims=True)
    mu_scaled2 = (kappa_ref * mu_ref).astype(x2.dtype)
    out2 = jax.block_until_ready(
        vmf_log_likelihood_pallas(x2, mu_scaled2, logC_ref, tb=128))
    ref2 = kappa_ref * jnp.sum(mu_ref[None, :] * x2, axis=1) + logC_ref
    assert out2.shape == (B2,)
    np.testing.assert_allclose(np.asarray(out2), np.asarray(ref2),
                               rtol=1e-5, atol=1e-5)

    print("KERNEL_OK")
</pallas_src>

<mosaic_0001>
module attributes {stable_mosaic.version = 11 : i64} {
  func.func @_vmf_kernel(%arg0: i32, %arg1: memref<1x1xf32, #tpu.memory_space<smem>>, %arg2: memref<16x32xf32, #tpu.memory_space<vmem>>, %arg3: memref<32x1xf32, #tpu.memory_space<vmem>>, %arg4: memref<16x1xf32, #tpu.memory_space<vmem>>) attributes {dimension_semantics = [#tpu.dimension_semantics<parallel>], iteration_bounds = array<i64: 1>, scalar_prefetch = 0 : i64, scratch_operands = 0 : i64, tpu.core_type = #tpu.core_type<tc>, window_params = [{transform_indices = @transform_0, window_bounds = array<i64: 1, 1>}, {transform_indices = @transform_1, window_bounds = array<i64: 16, 32>}, {pipeline_mode = #tpu.pipeline_mode<synchronous>, transform_indices = @transform_2, window_bounds = array<i64: 32, 1>}, {transform_indices = @transform_3, window_bounds = array<i64: 16, 1>}]} {
    %c0 = arith.constant 0 : index
    %c0_0 = arith.constant 0 : index
    %0 = memref.load %arg1[%c0, %c0_0] : memref<1x1xf32, #tpu.memory_space<smem>>
    %c0_1 = arith.constant 0 : index
    %c0_2 = arith.constant 0 : index
    %1 = vector.load %arg2[%c0_1, %c0_2] : memref<16x32xf32, #tpu.memory_space<vmem>>, vector<16x32xf32>
    %c0_3 = arith.constant 0 : index
    %c0_4 = arith.constant 0 : index
    %2 = vector.load %arg3[%c0_3, %c0_4] : memref<32x1xf32, #tpu.memory_space<vmem>>, vector<32x1xf32>
    %cst = arith.constant dense<0.000000e+00> : vector<16x1xf32>
    %3 = tpu.matmul %1, %2, %cst {dimension_numbers = #tpu.dot_dimension_numbers<[1], [0], [0], [1], [0, 0, 1, 1], [], []>} : vector<16x32xf32>, vector<32x1xf32>, vector<16x1xf32> -> vector<16x1xf32>
    %4 = vector.broadcast %0 : f32 to vector<16x1xf32>
    %5 = arith.addf %3, %4 : vector<16x1xf32>
    %c0_5 = arith.constant 0 : index
    %c0_6 = arith.constant 0 : index
    %6 = vector.load %arg4[%c0_5, %c0_6] : memref<16x1xf32, #tpu.memory_space<vmem>>, vector<16x1xf32>
    tpu.vector_store %arg4[%c0_5, %c0_6], %5 {strides = array<i32>} : memref<16x1xf32, #tpu.memory_space<vmem>>, vector<16x1xf32>,
    return
  }
  func.func @transform_0(%arg0: i32) -> (i32, i32) {
    %c0_i32 = arith.constant 0 : i32
    %c0_i32_0 = arith.constant 0 : i32
    %c0_i32_1 = arith.constant 0 : i32
    return %c0_i32, %c0_i32_0 : i32, i32
  }
  func.func @transform_1(%arg0: i32) -> (i32, i32) {
    %c0_i32 = arith.constant 0 : i32
    %c0_i32_0 = arith.constant 0 : i32
    return %arg0, %c0_i32 : i32, i32
  }
  func.func @transform_2(%arg0: i32) -> (i32, i32) {
    %c0_i32 = arith.constant 0 : i32
    %c0_i32_0 = arith.constant 0 : i32
    %c0_i32_1 = arith.constant 0 : i32
    return %c0_i32, %c0_i32_0 : i32, i32
  }
  func.func @transform_3(%arg0: i32) -> (i32, i32) {
    %c0_i32 = arith.constant 0 : i32
    %c0_i32_0 = arith.constant 0 : i32
    return %arg0, %c0_i32 : i32, i32
  }
}

</mosaic_0001>

<bundles_post_ra>
// kernel: tpu_custom_call.1
= control target key start
LH: loop header
LB: loop body
LE: loop exit
PB: predicated region body
PF: predicated region fallthrough
CT: control target
= control target key end

     0   :  { %vm23_vm0 = vcmask 261120   ;;  %vm105_vm1 = vcmask 7168   ;;  %s186_s2 = inlined_call_operand.vmem [shape: f32[32,1], index: 2, kind: input, shape index: {}]   ;;  %s187_s1 = inlined_call_operand.vmem [shape: f32[16,32], index: 1, kind: input, shape index: {}]   ;;  %s188_s0 = inlined_call_operand.<no memory space> [shape: f32[1,1], index: 0, kind: input, shape index: {}]   ;;  %s189_s3 = inlined_call_operand.vmem [shape: f32[16,1], index: 3, kind: output, shape index: {}]  }
   0x1   :  { %v18_v0 = vld [vmem:[%s186_s2] sm:$0xff]  ;;  %v19_v1 = vld [vmem:[%s186_s2 + $0x8] sm:$0xff]  ;;  %v20_v2 = vld [vmem:[%s186_s2 + $0x10] sm:$0xff]  ;;  %v22_v8 = vstv %s188_s0 }
   0x2   :  { %v131_v3 = vpack.c.bf16 %v19_v1, %v18_v0  ;;  %v21_v4 = vld [vmem:[%s186_s2 + $0x18] sm:$0xff]  ;;  %v16_v5 = vld [vmem:[%s187_s1] sm:$0xff]  ;;  %v17_v7 = vld [vmem:[%s187_s1 + $0x8] sm:$0xff] }
   0x3   :  { %v135_v6 = vpack.c.bf16 %v21_v4, %v20_v2  ;;  %128 = vmatprep.mubr.msk.f32.mxu0 %vm23_vm0, %v16_v5 }
   0x4   :  { %132 = vmatprep.subr.bf16.mxu0 %v131_v3 }
   0x5   :  { %134 = vmatpush3.bf16.msra.mxu0 %v131_v3 }
   0x6   :  { %136 = vmatprep.subr.bf16.mxu0 %v135_v6 }
   0x9   :  { %138 = vmatpush3.bf16.msra.mxu0 %v135_v6 }
   0xc   :  { %129 = vmatmul.mubr.msk.f32.vlgmr.msra.gmra.mrb[0].mxu0 %vm23_vm0, %v17_v7 }
  0xdf   :  { %v130_v9 = vpop.f32.mrb[0].mxu0 }
  0xe0   :  { %v102_v10 = vadd.f32 %v130_v9, %v22_v8  ;;  %v96_v11 = vpop.f32.mrb[1].mxu0 }
  0xe1   :  { %v97_v12 = vadd.f32 %v96_v11, %v22_v8 }
  0xe2   :  { %107 = vst.msk [vmem:[%s189_s3 + $0x8] sm:$0xff] %vm105_vm1, %v102_v10 }
  0xe3   :  { %106 = vst.msk [vmem:[%s189_s3] sm:$0xff] %vm105_vm1, %v97_v12 }

</bundles_post_ra>
